<compile_context>
chip_gen: v7x
topology: tpu7x:2x2x1
jax: 0.10.0
libtpu: 0.0.40
codegen_flags: <defaults>
</compile_context>

<pallas_src>
import functools

import jax
import jax.numpy as jnp
from jax.experimental import pallas as pl
from jax.experimental.pallas import tpu as pltpu

BN_EPS = 1e-5


# ----------------------------- in-kernel math ------------------------------

def _softplus(x):
    # numerically stable log(1 + exp(x))  (matches F.softplus)
    return jnp.maximum(x, 0.0) + jnp.log1p(jnp.exp(-jnp.abs(x)))


def _batchnorm_batchstats(x):
    # BatchNorm1d(affine=False), training-mode batch statistics, biased var.
    # Per-column -> exact under vocab (column) tiling.
    mean = jnp.mean(x, axis=0, keepdims=True)
    var = jnp.mean((x - mean) ** 2, axis=0, keepdims=True)
    return (x - mean) * jax.lax.rsqrt(var + BN_EPS)


def _recip(x):
    # EUP approximate reciprocal + one Newton step -> near-exact (f32) at the
    # cost of two VPU ops per element (only B per-row values here).
    r = pl.reciprocal(x, approx=True)
    return r * (2.0 - x * r)


# ------------------------------ encoder kernel ------------------------------
# Single small grid step: zeroshot inference net + fused mu/log_sigma head +
# reparameterize + theta softmax.

def encoder_kernel(xbert_ref, eps_ref, w1_ref, b1_ref, w2_ref, b2_ref,
                   wh_ref, bh_ref,
                   mu_ref, sigma_ref, logsig_ref, theta_ref, *, k):
    xb = xbert_ref[...]
    h = _softplus(jnp.dot(xb, w1_ref[...], preferred_element_type=jnp.float32)
                  + b1_ref[...])
    h = _softplus(jnp.dot(h, w2_ref[...], preferred_element_type=jnp.float32)
                  + b2_ref[...])
    # dropout_enc: identity (eval)

    # Fused mu/log_sigma head: one matmul + one BN (BN is per-column -> exact).
    head = _batchnorm_batchstats(
        jnp.dot(h, wh_ref[...], preferred_element_type=jnp.float32) + bh_ref[...])
    mu = head[:, :k]
    logsig = head[:, k:]
    std = jnp.exp(0.5 * logsig)

    mu_ref[...] = mu
    sigma_ref[...] = std * std           # == exp(logsig), one fewer exp
    logsig_ref[...] = logsig

    # reparameterize + theta softmax (internal; feeds the decoder)
    z = mu + eps_ref[...] * std
    e = jnp.exp(z - jnp.max(z, axis=1, keepdims=True))
    theta_ref[...] = e * _recip(jnp.sum(e, axis=1, keepdims=True))
    # drop_theta: identity (eval)


# ---------------------- decoder pass 1: softmax statistics ------------------
# Grid over vocab tiles (text tiles first, then visual tiles).  Online
# per-row max / exp-sum per segment; running state lives in VMEM scratch and
# is flushed to the tiny [B, 2] outputs at the segment boundary / last tile.

def decoder_stats_kernel(theta_ref, wdec_ref, m_out_ref, l_out_ref,
                         m_sc, l_sc, *, tv, vt, vt_pad, vv, n_text_tiles):
    t = pl.program_id(0)

    @pl.when(t == 0)
    def _():
        m_sc[...] = jnp.full_like(m_sc, -jnp.inf)
        l_sc[...] = jnp.zeros_like(l_sc)

    @pl.when(t == n_text_tiles)            # crossed text -> visual boundary
    def _():
        m_out_ref[:, 0:1] = m_sc[...]
        l_out_ref[:, 0:1] = l_sc[...]
        m_sc[...] = jnp.full_like(m_sc, -jnp.inf)
        l_sc[...] = jnp.zeros_like(l_sc)

    # bf16 x bf16 -> f32: halves the dominant w_dec HBM stream, native on v7x.
    theta_bf = theta_ref[...].astype(jnp.bfloat16)
    logits = _batchnorm_batchstats(
        jnp.dot(theta_bf, wdec_ref[...], preferred_element_type=jnp.float32))

    # Mask zero-padded vocab columns out of the softmax statistics.
    cols = t * tv + jax.lax.broadcasted_iota(jnp.int32, logits.shape, 1)
    valid = (cols < vt) | ((cols >= vt_pad) & (cols < vt_pad + vv))

    masked = jnp.where(valid, logits, -jnp.inf)
    m_new = jnp.maximum(m_sc[...], jnp.max(masked, axis=1, keepdims=True))
    l_sc[...] = (l_sc[...] * jnp.exp(m_sc[...] - m_new)
                 + jnp.sum(jnp.where(valid, jnp.exp(logits - m_new), 0.0),
                           axis=1, keepdims=True))
    m_sc[...] = m_new

    @pl.when(t == pl.num_programs(0) - 1)
    def _():
        m_out_ref[:, 1:2] = m_sc[...]
        l_out_ref[:, 1:2] = l_sc[...]


# ------------------------ decoder pass 2: normalize --------------------------
# Independent per vocab tile -> "parallel" grid axis (dual-TC on v7x).
# Recomputes the tile logits (cheaper than storing [B, V] logits since K << 4B)
# and writes normalized, lane-dense [B, tile] blocks.

def decoder_norm_kernel(theta_ref, m_ref, l_ref, wdec_ref, out_ref,
                        *, tv, vt, vt_pad, vv, n_text_tiles):
    t = pl.program_id(0)
    theta_bf = theta_ref[...].astype(jnp.bfloat16)
    logits = _batchnorm_batchstats(
        jnp.dot(theta_bf, wdec_ref[...], preferred_element_type=jnp.float32))

    is_text = t < n_text_tiles
    m_row = jnp.where(is_text, m_ref[:, 0:1], m_ref[:, 1:2])
    l_row = jnp.where(is_text, l_ref[:, 0:1], l_ref[:, 1:2])
    inv = _recip(l_row)                       # near-exact per-row normalization

    cols = t * tv + jax.lax.broadcasted_iota(jnp.int32, logits.shape, 1)
    valid = (cols < vt) | ((cols >= vt_pad) & (cols < vt_pad + vv))
    out_ref[...] = jnp.where(valid, jnp.exp(logits - m_row) * inv, 0.0)


# ------------------------------- wrappers ------------------------------------

def prepare_params(params, *, vocab_tile=512):
    """One-time weight fusion / padding / bf16 cast (NOT per forward call)."""
    assert vocab_tile % 128 == 0
    K, Vt = params["beta"].shape
    _, Vv = params["alpha"].shape
    tv = vocab_tile
    vt_pad = -(-Vt // tv) * tv
    vv_pad = -(-Vv // tv) * tv

    # Fused decoder weight [beta | alpha], zero-padded so each segment is a
    # whole number of lane-aligned vocab tiles, stored in bf16.
    w_dec = jnp.zeros((K, vt_pad + vv_pad), jnp.bfloat16)
    w_dec = w_dec.at[:, :Vt].set(params["beta"].astype(jnp.bfloat16))
    w_dec = w_dec.at[:, vt_pad:vt_pad + Vv].set(params["alpha"].astype(jnp.bfloat16))

    # Fused mu/log_sigma head (BN is per-column -> exact fusion).
    w_head = jnp.concatenate([params["wmu"], params["wsig"]], axis=1)
    b_head = jnp.concatenate([params["bmu"], params["bsig"]], axis=1)

    return dict(
        w1=params["w1"], b1=params["b1"], w2=params["w2"], b2=params["b2"],
        w_head=w_head, b_head=b_head, w_dec=w_dec,
        prior_mean=params["prior_mean"], prior_variance=params["prior_variance"],
        n_components=K, text_vocab=Vt, visual_vocab=Vv,
        text_vocab_pad=vt_pad, visual_vocab_pad=vv_pad, vocab_tile=tv,
    )


def decoder_network_forward(prep, x, x_bert, eps):
    """Mirrors DecoderNetwork.forward(x, x_bert, labels=None).

    Returns (prior_mean, prior_variance, posterior_mu, posterior_sigma,
             posterior_log_sigma, text_word_dist, visual_word_dist, None).
    """
    del x  # zeroshot ContextualInferenceNetwork ignores the BoW input
    B = x_bert.shape[0]
    K = prep["n_components"]
    Vt, Vv = prep["text_vocab"], prep["visual_vocab"]
    vt_pad, vv_pad = prep["text_vocab_pad"], prep["visual_vocab_pad"]
    tv = prep["vocab_tile"]
    n_tiles = (vt_pad + vv_pad) // tv
    n_text_tiles = vt_pad // tv

    # ---- encoder (single small step) ----------------------------------------
    enc_ins = (x_bert, eps, prep["w1"], prep["b1"], prep["w2"], prep["b2"],
               prep["w_head"], prep["b_head"])
    mu, sigma, log_sigma, theta = pl.pallas_call(
        functools.partial(encoder_kernel, k=K),
        grid=(1,),
        in_specs=[pl.BlockSpec(a.shape, lambda i: (0, 0)) for a in enc_ins],
        out_specs=tuple(pl.BlockSpec((B, K), lambda i: (0, 0)) for _ in range(4)),
        out_shape=tuple(jax.ShapeDtypeStruct((B, K), jnp.float32) for _ in range(4)),
        compiler_params=pltpu.CompilerParams(dimension_semantics=("arbitrary",)),
    )(*enc_ins)

    seg_kwargs = dict(tv=tv, vt=Vt, vt_pad=vt_pad, vv=Vv,
                      n_text_tiles=n_text_tiles)

    # ---- decoder pass 1: per-segment online softmax stats --------------------
    m_seg, l_seg = pl.pallas_call(
        functools.partial(decoder_stats_kernel, **seg_kwargs),
        grid=(n_tiles,),
        in_specs=[pl.BlockSpec((B, K), lambda t: (0, 0)),      # theta (invariant)
                  pl.BlockSpec((K, tv), lambda t: (0, t))],    # bf16 w_dec tile
        out_specs=(pl.BlockSpec((B, 2), lambda t: (0, 0)),
                   pl.BlockSpec((B, 2), lambda t: (0, 0))),
        out_shape=(jax.ShapeDtypeStruct((B, 2), jnp.float32),
                   jax.ShapeDtypeStruct((B, 2), jnp.float32)),
        scratch_shapes=[pltpu.VMEM((B, 1), jnp.float32),
                        pltpu.VMEM((B, 1), jnp.float32)],
        compiler_params=pltpu.CompilerParams(dimension_semantics=("arbitrary",)),
    )(theta, prep["w_dec"])

    # ---- decoder pass 2: normalized word distributions (parallel tiles) ------
    out_pad = pl.pallas_call(
        functools.partial(decoder_norm_kernel, **seg_kwargs),
        grid=(n_tiles,),
        in_specs=[pl.BlockSpec((B, K), lambda t: (0, 0)),
                  pl.BlockSpec((B, 2), lambda t: (0, 0)),
                  pl.BlockSpec((B, 2), lambda t: (0, 0)),
                  pl.BlockSpec((K, tv), lambda t: (0, t))],
        out_specs=pl.BlockSpec((B, tv), lambda t: (0, t)),
        out_shape=jax.ShapeDtypeStruct((B, vt_pad + vv_pad), jnp.float32),
        compiler_params=pltpu.CompilerParams(dimension_semantics=("parallel",)),
    )(theta, m_seg, l_seg, prep["w_dec"])

    text_word_dist = out_pad[:, :Vt]
    visual_word_dist = out_pad[:, vt_pad:vt_pad + Vv]

    return (prep["prior_mean"], prep["prior_variance"],
            mu, sigma, log_sigma, text_word_dist, visual_word_dist, None)


# --------------------------- parameter init ---------------------------------

def init_params(key, text_input_size, visual_input_size, bert_size,
                n_components, hidden_sizes):
    ks = jax.random.split(key, 10)

    def linear(kw, kb, fan_in, fan_out):
        bound = 1.0 / jnp.sqrt(float(fan_in))
        w = jax.random.uniform(kw, (fan_in, fan_out), jnp.float32, -bound, bound)
        b = jax.random.uniform(kb, (1, fan_out), jnp.float32, -bound, bound)
        return w, b

    def xavier_uniform(k, fan_in, fan_out):
        bound = jnp.sqrt(6.0 / float(fan_in + fan_out))
        return jax.random.uniform(k, (fan_in, fan_out), jnp.float32, -bound, bound)

    h0, h1 = hidden_sizes
    w1, b1 = linear(ks[0], ks[1], bert_size, h0)
    w2, b2 = linear(ks[2], ks[3], h0, h1)
    wmu, bmu = linear(ks[4], ks[5], h1, n_components)
    wsig, bsig = linear(ks[6], ks[7], h1, n_components)
    beta = xavier_uniform(ks[8], n_components, text_input_size)
    alpha = xavier_uniform(ks[9], n_components, visual_input_size)

    prior_mean = jnp.zeros((n_components,), jnp.float32)
    prior_variance = jnp.full((n_components,),
                              1.0 - 1.0 / n_components, jnp.float32)

    return dict(w1=w1, b1=b1, w2=w2, b2=b2,
                wmu=wmu, bmu=bmu, wsig=wsig, bsig=bsig,
                beta=beta, alpha=alpha,
                prior_mean=prior_mean, prior_variance=prior_variance)


# ---------------------------- pure-JAX reference -----------------------------

def reference_forward(params, x_bert, eps):
    def softplus(v):
        return jnp.maximum(v, 0.0) + jnp.log1p(jnp.exp(-jnp.abs(v)))

    def bn(v):
        m = jnp.mean(v, axis=0, keepdims=True)
        var = jnp.mean((v - m) ** 2, axis=0, keepdims=True)
        return (v - m) / jnp.sqrt(var + BN_EPS)

    h = softplus(x_bert @ params["w1"] + params["b1"])
    h = softplus(h @ params["w2"] + params["b2"])
    mu = bn(h @ params["wmu"] + params["bmu"])
    logsig = bn(h @ params["wsig"] + params["bsig"])
    sigma = jnp.exp(logsig)
    theta = jax.nn.softmax(mu + eps * jnp.exp(0.5 * logsig), axis=1)
    text = jax.nn.softmax(bn(theta @ params["beta"]), axis=1)
    vis = jax.nn.softmax(bn(theta @ params["alpha"]), axis=1)
    return mu, sigma, logsig, theta, text, vis


# --------------------------------- main --------------------------------------

if __name__ == "__main__":
    B = 8
    text_input_size = 300      # deliberately not a tile multiple: exercises padding
    visual_input_size = 200
    bert_size = 32
    n_components = 16
    hidden_sizes = (32, 32)
    vocab_tile = 128           # small test tile -> 3 text + 2 visual grid tiles

    root = jax.random.PRNGKey(0)
    k_par, k_x, k_bert, k_eps = jax.random.split(root, 4)

    params = init_params(k_par, text_input_size, visual_input_size,
                         bert_size, n_components, hidden_sizes)
    prep = prepare_params(params, vocab_tile=vocab_tile)

    # x = concatenated text+visual BoW (unused by the zeroshot inference net)
    x = jax.random.normal(k_x, (B, text_input_size + visual_input_size),
                          jnp.float32)
    x_bert = jax.random.normal(k_bert, (B, bert_size), jnp.float32)
    eps = jax.random.normal(k_eps, (B, n_components), jnp.float32)

    outs = decoder_network_forward(prep, x, x_bert, eps)
    jax.block_until_ready([o for o in outs if o is not None])

    (prior_mean, prior_var, mu, sigma, log_sigma,
     text_word_dist, visual_word_dist, est_labels) = outs

    # reference check (encoder path is f32-exact; decoder uses bf16 weights)
    ref_mu, ref_sigma, ref_logsig, _, ref_text, ref_vis = reference_forward(
        params, x_bert, eps)
    assert jnp.allclose(mu, ref_mu, atol=1e-4)
    assert jnp.allclose(sigma, ref_sigma, atol=1e-4)
    assert jnp.allclose(log_sigma, ref_logsig, atol=1e-4)
    assert jnp.allclose(text_word_dist, ref_text, atol=2e-3)
    assert jnp.allclose(visual_word_dist, ref_vis, atol=2e-3)

    # word distributions sum to ~1 per row (Newton-refined reciprocal -> tight)
    assert jnp.allclose(jnp.sum(text_word_dist, axis=1), 1.0, atol=1e-4)
    assert jnp.allclose(jnp.sum(visual_word_dist, axis=1), 1.0, atol=1e-4)

    assert mu.shape == (B, n_components) and sigma.shape == (B, n_components)
    assert text_word_dist.shape == (B, text_input_size)
    assert visual_word_dist.shape == (B, visual_input_size)
    assert est_labels is None

    print("KERNEL_OK")
</pallas_src>

<mosaic_0001>
module attributes {stable_mosaic.version = 11 : i64} {
  func.func @encoder_kernel(%arg0: i32, %arg1: memref<8x32xf32, #tpu.memory_space<vmem>>, %arg2: memref<8x16xf32, #tpu.memory_space<vmem>>, %arg3: memref<32x32xf32, #tpu.memory_space<vmem>>, %arg4: memref<1x32xf32, #tpu.memory_space<vmem>>, %arg5: memref<32x32xf32, #tpu.memory_space<vmem>>, %arg6: memref<1x32xf32, #tpu.memory_space<vmem>>, %arg7: memref<32x32xf32, #tpu.memory_space<vmem>>, %arg8: memref<1x32xf32, #tpu.memory_space<vmem>>, %arg9: memref<8x16xf32, #tpu.memory_space<vmem>>, %arg10: memref<8x16xf32, #tpu.memory_space<vmem>>, %arg11: memref<8x16xf32, #tpu.memory_space<vmem>>, %arg12: memref<8x16xf32, #tpu.memory_space<vmem>>) attributes {dimension_semantics = [#tpu.dimension_semantics<arbitrary>], iteration_bounds = array<i64: 1>, scalar_prefetch = 0 : i64, scratch_operands = 0 : i64, tpu.core_type = #tpu.core_type<tc>, window_params = [{pipeline_mode = #tpu.pipeline_mode<synchronous>, transform_indices = @transform_0, window_bounds = array<i64: 8, 32>}, {pipeline_mode = #tpu.pipeline_mode<synchronous>, transform_indices = @transform_1, window_bounds = array<i64: 8, 16>}, {pipeline_mode = #tpu.pipeline_mode<synchronous>, transform_indices = @transform_2, window_bounds = array<i64: 32, 32>}, {pipeline_mode = #tpu.pipeline_mode<synchronous>, transform_indices = @transform_3, window_bounds = array<i64: 1, 32>}, {pipeline_mode = #tpu.pipeline_mode<synchronous>, transform_indices = @transform_4, window_bounds = array<i64: 32, 32>}, {pipeline_mode = #tpu.pipeline_mode<synchronous>, transform_indices = @transform_5, window_bounds = array<i64: 1, 32>}, {pipeline_mode = #tpu.pipeline_mode<synchronous>, transform_indices = @transform_6, window_bounds = array<i64: 32, 32>}, {pipeline_mode = #tpu.pipeline_mode<synchronous>, transform_indices = @transform_7, window_bounds = array<i64: 1, 32>}, {pipeline_mode = #tpu.pipeline_mode<synchronous>, transform_indices = @transform_8, window_bounds = array<i64: 8, 16>}, {pipeline_mode = #tpu.pipeline_mode<synchronous>, transform_indices = @transform_9, window_bounds = array<i64: 8, 16>}, {pipeline_mode = #tpu.pipeline_mode<synchronous>, transform_indices = @transform_10, window_bounds = array<i64: 8, 16>}, {pipeline_mode = #tpu.pipeline_mode<synchronous>, transform_indices = @transform_11, window_bounds = array<i64: 8, 16>}]} {
    %c0 = arith.constant 0 : index
    %c0_0 = arith.constant 0 : index
    %0 = vector.load %arg1[%c0, %c0_0] : memref<8x32xf32, #tpu.memory_space<vmem>>, vector<8x32xf32>
    %c0_1 = arith.constant 0 : index
    %c0_2 = arith.constant 0 : index
    %1 = vector.load %arg3[%c0_1, %c0_2] : memref<32x32xf32, #tpu.memory_space<vmem>>, vector<32x32xf32>
    %cst = arith.constant dense<0.000000e+00> : vector<8x32xf32>
    %2 = tpu.matmul %0, %1, %cst {dimension_numbers = #tpu.dot_dimension_numbers<[1], [0], [0], [1], [0, 0, 1, 1], [], []>} : vector<8x32xf32>, vector<32x32xf32>, vector<8x32xf32> -> vector<8x32xf32>
    %c0_3 = arith.constant 0 : index
    %c0_4 = arith.constant 0 : index
    %3 = vector.load %arg4[%c0_3, %c0_4] : memref<1x32xf32, #tpu.memory_space<vmem>>, vector<1x32xf32>
    %4 = vector.broadcast %3 : vector<1x32xf32> to vector<8x32xf32>
    %5 = arith.addf %2, %4 : vector<8x32xf32>
    %cst_5 = arith.constant 0.000000e+00 : f32
    %6 = vector.broadcast %cst_5 : f32 to vector<8x32xf32>
    %7 = arith.maximumf %5, %6 : vector<8x32xf32>
    %8 = math.absf %5 : vector<8x32xf32>
    %cst_6 = arith.constant 0.000000e+00 : f32
    %9 = vector.broadcast %cst_6 : f32 to vector<8x32xf32>
    %10 = arith.subf %9, %8 : vector<8x32xf32>
    %11 = math.exp %10 : vector<8x32xf32>
    %12 = math.log1p %11 : vector<8x32xf32>
    %13 = arith.addf %7, %12 : vector<8x32xf32>
    %c0_7 = arith.constant 0 : index
    %c0_8 = arith.constant 0 : index
    %14 = vector.load %arg5[%c0_7, %c0_8] : memref<32x32xf32, #tpu.memory_space<vmem>>, vector<32x32xf32>
    %cst_9 = arith.constant dense<0.000000e+00> : vector<8x32xf32>
    %15 = tpu.matmul %13, %14, %cst_9 {dimension_numbers = #tpu.dot_dimension_numbers<[1], [0], [0], [1], [0, 0, 1, 1], [], []>} : vector<8x32xf32>, vector<32x32xf32>, vector<8x32xf32> -> vector<8x32xf32>
    %c0_10 = arith.constant 0 : index
    %c0_11 = arith.constant 0 : index
    %16 = vector.load %arg6[%c0_10, %c0_11] : memref<1x32xf32, #tpu.memory_space<vmem>>, vector<1x32xf32>
    %17 = vector.broadcast %16 : vector<1x32xf32> to vector<8x32xf32>
    %18 = arith.addf %15, %17 : vector<8x32xf32>
    %cst_12 = arith.constant 0.000000e+00 : f32
    %19 = vector.broadcast %cst_12 : f32 to vector<8x32xf32>
    %20 = arith.maximumf %18, %19 : vector<8x32xf32>
    %21 = math.absf %18 : vector<8x32xf32>
    %cst_13 = arith.constant 0.000000e+00 : f32
    %22 = vector.broadcast %cst_13 : f32 to vector<8x32xf32>
    %23 = arith.subf %22, %21 : vector<8x32xf32>
    %24 = math.exp %23 : vector<8x32xf32>
    %25 = math.log1p %24 : vector<8x32xf32>
    %26 = arith.addf %20, %25 : vector<8x32xf32>
    %c0_14 = arith.constant 0 : index
    %c0_15 = arith.constant 0 : index
    %27 = vector.load %arg7[%c0_14, %c0_15] : memref<32x32xf32, #tpu.memory_space<vmem>>, vector<32x32xf32>
    %cst_16 = arith.constant dense<0.000000e+00> : vector<8x32xf32>
    %28 = tpu.matmul %26, %27, %cst_16 {dimension_numbers = #tpu.dot_dimension_numbers<[1], [0], [0], [1], [0, 0, 1, 1], [], []>} : vector<8x32xf32>, vector<32x32xf32>, vector<8x32xf32> -> vector<8x32xf32>
    %c0_17 = arith.constant 0 : index
    %c0_18 = arith.constant 0 : index
    %29 = vector.load %arg8[%c0_17, %c0_18] : memref<1x32xf32, #tpu.memory_space<vmem>>, vector<1x32xf32>
    %30 = vector.broadcast %29 : vector<1x32xf32> to vector<8x32xf32>
    %31 = arith.addf %28, %30 : vector<8x32xf32>
    %cst_19 = arith.constant dense<0.000000e+00> : vector<32xf32>
    %32 = vector.multi_reduction <add>, %31, %cst_19 [0] : vector<8x32xf32> to vector<32xf32>
    %33 = vector.shape_cast %32 : vector<32xf32> to vector<1x32xf32>
    %cst_20 = arith.constant 8.000000e+00 : f32
    %34 = vector.broadcast %cst_20 : f32 to vector<1x32xf32>
    %35 = arith.divf %33, %34 : vector<1x32xf32>
    %36 = vector.broadcast %35 : vector<1x32xf32> to vector<8x32xf32>
    %37 = arith.subf %31, %36 : vector<8x32xf32>
    %38 = arith.mulf %37, %37 : vector<8x32xf32>
    %cst_21 = arith.constant dense<0.000000e+00> : vector<32xf32>
    %39 = vector.multi_reduction <add>, %38, %cst_21 [0] : vector<8x32xf32> to vector<32xf32>
    %40 = vector.shape_cast %39 : vector<32xf32> to vector<1x32xf32>
    %cst_22 = arith.constant 8.000000e+00 : f32
    %41 = vector.broadcast %cst_22 : f32 to vector<1x32xf32>
    %42 = arith.divf %40, %41 : vector<1x32xf32>
    %43 = vector.broadcast %35 : vector<1x32xf32> to vector<8x32xf32>
    %44 = arith.subf %31, %43 : vector<8x32xf32>
    %cst_23 = arith.constant 9.99999974E-6 : f32
    %45 = vector.broadcast %cst_23 : f32 to vector<1x32xf32>
    %46 = arith.addf %42, %45 : vector<1x32xf32>
    %47 = math.rsqrt %46 : vector<1x32xf32>
    %48 = vector.broadcast %47 : vector<1x32xf32> to vector<8x32xf32>
    %49 = arith.mulf %44, %48 : vector<8x32xf32>
    %50 = vector.extract_strided_slice %49 {offsets = [0, 0], sizes = [8, 16], strides = [1, 1]} : vector<8x32xf32> to vector<8x16xf32>
    %51 = vector.extract_strided_slice %49 {offsets = [0, 16], sizes = [8, 16], strides = [1, 1]} : vector<8x32xf32> to vector<8x16xf32>
    %cst_24 = arith.constant 5.000000e-01 : f32
    %52 = vector.broadcast %cst_24 : f32 to vector<8x16xf32>
    %53 = arith.mulf %52, %51 : vector<8x16xf32>
    %54 = math.exp %53 : vector<8x16xf32>
    %c0_25 = arith.constant 0 : index
    %c0_26 = arith.constant 0 : index
    %55 = vector.load %arg9[%c0_25, %c0_26] : memref<8x16xf32, #tpu.memory_space<vmem>>, vector<8x16xf32>
    tpu.vector_store %arg9[%c0_25, %c0_26], %50 {strides = array<i32>} : memref<8x16xf32, #tpu.memory_space<vmem>>, vector<8x16xf32>,
    %56 = arith.mulf %54, %54 : vector<8x16xf32>
    %c0_27 = arith.constant 0 : index
    %c0_28 = arith.constant 0 : index
    %57 = vector.load %arg10[%c0_27, %c0_28] : memref<8x16xf32, #tpu.memory_space<vmem>>, vector<8x16xf32>
    tpu.vector_store %arg10[%c0_27, %c0_28], %56 {strides = array<i32>} : memref<8x16xf32, #tpu.memory_space<vmem>>, vector<8x16xf32>,
    %c0_29 = arith.constant 0 : index
    %c0_30 = arith.constant 0 : index
    %58 = vector.load %arg11[%c0_29, %c0_30] : memref<8x16xf32, #tpu.memory_space<vmem>>, vector<8x16xf32>
    tpu.vector_store %arg11[%c0_29, %c0_30], %51 {strides = array<i32>} : memref<8x16xf32, #tpu.memory_space<vmem>>, vector<8x16xf32>,
    %c0_31 = arith.constant 0 : index
    %c0_32 = arith.constant 0 : index
    %59 = vector.load %arg2[%c0_31, %c0_32] : memref<8x16xf32, #tpu.memory_space<vmem>>, vector<8x16xf32>
    %60 = arith.mulf %59, %54 : vector<8x16xf32>
    %61 = arith.addf %50, %60 : vector<8x16xf32>
    %cst_33 = arith.constant dense<0xFF800000> : vector<8xf32>
    %62 = vector.multi_reduction <maximumf>, %61, %cst_33 [1] : vector<8x16xf32> to vector<8xf32>
    %63 = vector.shape_cast %62 : vector<8xf32> to vector<8x1xf32>
    %64 = vector.broadcast %63 : vector<8x1xf32> to vector<8x16xf32>
    %65 = arith.subf %61, %64 : vector<8x16xf32>
    %66 = math.exp %65 : vector<8x16xf32>
    %cst_34 = arith.constant dense<0.000000e+00> : vector<8xf32>
    %67 = vector.multi_reduction <add>, %66, %cst_34 [1] : vector<8x16xf32> to vector<8xf32>
    %68 = vector.shape_cast %67 : vector<8xf32> to vector<8x1xf32>
    %69 = tpu.reciprocal %68 {approx = true} : vector<8x1xf32> -> vector<8x1xf32>
    %70 = arith.mulf %68, %69 : vector<8x1xf32>
    %cst_35 = arith.constant 2.000000e+00 : f32
    %71 = vector.broadcast %cst_35 : f32 to vector<8x1xf32>
    %72 = arith.subf %71, %70 : vector<8x1xf32>
    %73 = arith.mulf %69, %72 : vector<8x1xf32>
    %74 = vector.broadcast %73 : vector<8x1xf32> to vector<8x16xf32>
    %75 = arith.mulf %66, %74 : vector<8x16xf32>
    %c0_36 = arith.constant 0 : index
    %c0_37 = arith.constant 0 : index
    %76 = vector.load %arg12[%c0_36, %c0_37] : memref<8x16xf32, #tpu.memory_space<vmem>>, vector<8x16xf32>
    tpu.vector_store %arg12[%c0_36, %c0_37], %75 {strides = array<i32>} : memref<8x16xf32, #tpu.memory_space<vmem>>, vector<8x16xf32>,
    return
  }
  func.func @transform_0(%arg0: i32) -> (i32, i32) {
    %c0_i32 = arith.constant 0 : i32
    %c0_i32_0 = arith.constant 0 : i32
    %c0_i32_1 = arith.constant 0 : i32
    return %c0_i32, %c0_i32_0 : i32, i32
  }
  func.func @transform_1(%arg0: i32) -> (i32, i32) {
    %c0_i32 = arith.constant 0 : i32
    %c0_i32_0 = arith.constant 0 : i32
    %c0_i32_1 = arith.constant 0 : i32
    return %c0_i32, %c0_i32_0 : i32, i32
  }
  func.func @transform_2(%arg0: i32) -> (i32, i32) {
    %c0_i32 = arith.constant 0 : i32
    %c0_i32_0 = arith.constant 0 : i32
    %c0_i32_1 = arith.constant 0 : i32
    return %c0_i32, %c0_i32_0 : i32, i32
  }
  func.func @transform_3(%arg0: i32) -> (i32, i32) {
    %c0_i32 = arith.constant 0 : i32
    %c0_i32_0 = arith.constant 0 : i32
    %c0_i32_1 = arith.constant 0 : i32
    return %c0_i32, %c0_i32_0 : i32, i32
  }
  func.func @transform_4(%arg0: i32) -> (i32, i32) {
    %c0_i32 = arith.constant 0 : i32
    %c0_i32_0 = arith.constant 0 : i32
    %c0_i32_1 = arith.constant 0 : i32
    return %c0_i32, %c0_i32_0 : i32, i32
  }
  func.func @transform_5(%arg0: i32) -> (i32, i32) {
    %c0_i32 = arith.constant 0 : i32
    %c0_i32_0 = arith.constant 0 : i32
    %c0_i32_1 = arith.constant 0 : i32
    return %c0_i32, %c0_i32_0 : i32, i32
  }
  func.func @transform_6(%arg0: i32) -> (i32, i32) {
    %c0_i32 = arith.constant 0 : i32
    %c0_i32_0 = arith.constant 0 : i32
    %c0_i32_1 = arith.constant 0 : i32
    return %c0_i32, %c0_i32_0 : i32, i32
  }
  func.func @transform_7(%arg0: i32) -> (i32, i32) {
    %c0_i32 = arith.constant 0 : i32
    %c0_i32_0 = arith.constant 0 : i32
    %c0_i32_1 = arith.constant 0 : i32
    return %c0_i32, %c0_i32_0 : i32, i32
  }
  func.func @transform_8(%arg0: i32) -> (i32, i32) {
    %c0_i32 = arith.constant 0 : i32
    %c0_i32_0 = arith.constant 0 : i32
    %c0_i32_1 = arith.constant 0 : i32
    return %c0_i32, %c0_i32_0 : i32, i32
  }
  func.func @transform_9(%arg0: i32) -> (i32, i32) {
    %c0_i32 = arith.constant 0 : i32
    %c0_i32_0 = arith.constant 0 : i32
    %c0_i32_1 = arith.constant 0 : i32
    return %c0_i32, %c0_i32_0 : i32, i32
  }
  func.func @transform_10(%arg0: i32) -> (i32, i32) {
    %c0_i32 = arith.constant 0 : i32
    %c0_i32_0 = arith.constant 0 : i32
    %c0_i32_1 = arith.constant 0 : i32
    return %c0_i32, %c0_i32_0 : i32, i32
  }
  func.func @transform_11(%arg0: i32) -> (i32, i32) {
    %c0_i32 = arith.constant 0 : i32
    %c0_i32_0 = arith.constant 0 : i32
    %c0_i32_1 = arith.constant 0 : i32
    return %c0_i32, %c0_i32_0 : i32, i32
  }
}

</mosaic_0001>

<bundles_post_ra>
// kernel: tpu_custom_call.1
= control target key start
LH: loop header
LB: loop body
LE: loop exit
PB: predicated region body
PF: predicated region fallthrough
CT: control target
= control target key end

     0   :  { %17 = vsyncpa [#allocation3], 0  ;;  %s1030_s0 = inlined_call_operand.hbm [shape: f32[8,32], index: 0, kind: input, shape index: {}]   ;;  %s1031_s1 = inlined_call_operand.hbm [shape: f32[8,16], index: 1, kind: input, shape index: {}]   ;;  %s1032_s2 = inlined_call_operand.hbm [shape: f32[32,32], index: 2, kind: input, shape index: {}]   ;;  %s1033_s3 = inlined_call_operand.vmem [shape: f32[1,32], index: 3, kind: input, shape index: {}]   ;;  %s1034_s4 = inlined_call_operand.hbm [shape: f32[32,32], index: 4, kind: input, shape index: {}]   ;;  %s1035_s5 = inlined_call_operand.vmem [shape: f32[1,32], index: 5, kind: input, shape index: {}]   ;;  %s1036_s6 = inlined_call_operand.hbm [shape: f32[32,32], index: 6, kind: input, shape index: {}]   ;;  %s1037_s7 = inlined_call_operand.vmem [shape: f32[1,32], index: 7, kind: input, shape index: {}]   ;;  %s1038_s8 = inlined_call_operand.hbm [shape: f32[8,16], index: 8, kind: output, shape index: {0}]   ;;  %s1039_s9 = inlined_call_operand.hbm [shape: f32[8,16], index: 9, kind: output, shape index: {1}]   ;;  %s1040_s10 = inlined_call_operand.hbm [shape: f32[8,16], index: 10, kind: output, shape index: {2}]   ;;  %s1041_s11 = inlined_call_operand.hbm [shape: f32[8,16], index: 11, kind: output, shape index: {3}]  }
   0x1   :  { %18 = vsyncpa [#allocation6], 0 }
   0x2   :  { %19 = vsyncpa [#allocation9], 0 }
   0x3   :  { %20 = vsyncpa [#allocation4], 0 }
   0x4   :  { %21 = vsyncpa [#allocation13], 0 }
   0x5   :  { %22 = vsyncpa [#allocation16], 0  ;;  %s815_s17 = smov [#allocation5]   ;;  %s605_s21 = scalar_lea.hbm %s1031_s1, 128 }
   0x6   :  { %s39_s18 = sshll.u32 %s815_s17, 4  ;;  %p606_p0 = scmp.ne.s32.totalorder %s1031_s1, %s605_s21  ;;  %s40_s18 = int_to_ptr.vmem [resolvable:$true] %s39_s18 }
   0x7   :  { %p609_p1 = scmp.lt.u32.totalorder %s605_s21, %s1031_s1 }
   0x9   :  { %p611_p2 = pnand %p609_p1, %p606_p0 }
   0xb   :  { %614 = shalt.err (!%p611_p2)
}
   0xc   :  { %s615_s26 = scalar_lea.vmem %s40_s18, 128  ;;  %p620_p4 = scmp.lt.s32.totalorder %s40_s18, %s40_s18 }
   0xd   :  { %p616_p3 = scmp.ne.s32.totalorder %s40_s18, %s615_s26  ;;  %p621_p5 = scmp.lt.s32.totalorder %s615_s26, %s615_s26 }
   0xf   :  { %p622_p6 = por %p621_p5, %p620_p4 }
  0x11   :  { %p623_p7 = pnand %p622_p6, %p616_p3 }
  0x13   :  { %626 = shalt.err (!%p623_p7)
}
  0x14   :  { %42 = dma.hbm_to_vmem [thread:$0]  %s1031_s1, 128, %s40_s18, [#allocation6]  }
  0x15   :  { %s816_s29 = smov [#allocation8]   ;;  %s817_s12 = smov [#allocation2]  }
  0x16   :  { %s62_s30 = sshll.u32 %s816_s29, 4  ;;  %s29_s13 = sshll.u32 %s817_s12, 4  ;;  %s63_s30 = int_to_ptr.vmem [resolvable:$true] %s62_s30  ;;  %s30_s13 = int_to_ptr.vmem [resolvable:$true] %s29_s13 }
  0x17   :  { %s627_s16 = scalar_lea.hbm %s1034_s4, 512 }
  0x18   :  { %p628_p8 = scmp.ne.s32.totalorder %s1034_s4, %s627_s16  ;;  %p631_p9 = scmp.lt.u32.totalorder %s627_s16, %s1034_s4 }
  0x1a   :  { %p633_p10 = pnand %p631_p9, %p628_p8 }
  0x1c   :  { %636 = shalt.err (!%p633_p10)
}
  0x1d   :  { %s637_s1 = scalar_lea.vmem %s63_s30, 512  ;;  %p642_p12 = scmp.lt.s32.totalorder %s63_s30, %s63_s30 }
  0x1e   :  { %p638_p11 = scmp.ne.s32.totalorder %s63_s30, %s637_s1  ;;  %p643_p13 = scmp.lt.s32.totalorder %s637_s1, %s637_s1 }
  0x20   :  { %p644_p0 = por %p643_p13, %p642_p12 }
  0x22   :  { %p645_p1 = pnand %p644_p0, %p638_p11 }
  0x24   :  { %648 = shalt.err (!%p645_p1)
}
  0x25   :  { %s818_s18 = smov 128   ;;  %s819_s22 = smov 8  }
  0x26   :  { %68 = dma.hbm_to_vmem [thread:$0]  %s1034_s4, 512, %s63_s30, [#allocation9], %s818_s18, %s818_s18, %s819_s22  }
  0x27   :  { %s649_s27 = scalar_lea.hbm %s1030_s0, 128 }
  0x28   :  { %p650_p2 = scmp.ne.s32.totalorder %s1030_s0, %s649_s27  ;;  %p653_p3 = scmp.lt.u32.totalorder %s649_s27, %s1030_s0 }
  0x2a   :  { %p655_p4 = pnand %p653_p3, %p650_p2 }
  0x2c   :  { %658 = shalt.err (!%p655_p4)
}
  0x2d   :  { %s659_s15 = scalar_lea.vmem %s30_s13, 128  ;;  %p664_p6 = scmp.lt.s32.totalorder %s30_s13, %s30_s13 }
  0x2e   :  { %p660_p5 = scmp.ne.s32.totalorder %s30_s13, %s659_s15  ;;  %p665_p7 = scmp.lt.s32.totalorder %s659_s15, %s659_s15 }
  0x30   :  { %p666_p8 = por %p665_p7, %p664_p6 }
  0x32   :  { %p667_p9 = pnand %p666_p8, %p660_p5 }
  0x34   :  { %670 = shalt.err (!%p667_p9)
}
  0x35   :  { %32 = dma.hbm_to_vmem [thread:$0]  %s1030_s0, 128, %s30_s13, [#allocation3]  }
  0x36   :  { %s820_s16 = smov [#allocation7]   ;;  %s821_s19 = smov [#allocation10]  }
  0x37   :  { %s48_s17 = sshll.u32 %s820_s16, 4  ;;  %s76_s20 = sshll.u32 %s821_s19, 4  ;;  %s49_s17 = int_to_ptr.vmem [resolvable:$true] %s48_s17  ;;  %s77_s20 = int_to_ptr.vmem [resolvable:$true] %s76_s20 }
  0x38   :  { %s671_s23 = scalar_lea.hbm %s1032_s2, 512 }
  0x39   :  { %p672_p10 = scmp.ne.s32.totalorder %s1032_s2, %s671_s23  ;;  %p675_p11 = scmp.lt.u32.totalorder %s671_s23, %s1032_s2 }
  0x3b   :  { %p677_p12 = pnand %p675_p11, %p672_p10 }
  0x3d   :  { %680 = shalt.err (!%p677_p12)
}
  0x3e   :  { %s681_s0 = scalar_lea.vmem %s49_s17, 512  ;;  %p686_p0 = scmp.lt.s32.totalorder %s49_s17, %s49_s17 }
  0x3f   :  { %p682_p13 = scmp.ne.s32.totalorder %s49_s17, %s681_s0  ;;  %p687_p1 = scmp.lt.s32.totalorder %s681_s0, %s681_s0 }
  0x41   :  { %p688_p2 = por %p687_p1, %p686_p0 }
  0x43   :  { %p689_p3 = pnand %p688_p2, %p682_p13 }
  0x45   :  { %692 = shalt.err (!%p689_p3)
}
  0x46   :  { %54 = dma.hbm_to_vmem [thread:$0]  %s1032_s2, 512, %s49_s17, [#allocation6], %s818_s18, %s818_s18, %s819_s22  }
  0x47   :  { %s693_s14 = scalar_lea.hbm %s1036_s6, 512 }
  0x48   :  { %p694_p4 = scmp.ne.s32.totalorder %s1036_s6, %s693_s14  ;;  %p697_p5 = scmp.lt.u32.totalorder %s693_s14, %s1036_s6 }
  0x4a   :  { %p699_p6 = pnand %p697_p5, %p694_p4 }
  0x4c   :  { %702 = shalt.err (!%p699_p6)
}
  0x4d   :  { %s703_s19 = scalar_lea.vmem %s77_s20, 512  ;;  %p708_p8 = scmp.lt.s32.totalorder %s77_s20, %s77_s20 }
  0x4e   :  { %p704_p7 = scmp.ne.s32.totalorder %s77_s20, %s703_s19  ;;  %p709_p9 = scmp.lt.s32.totalorder %s703_s19, %s703_s19 }
  0x50   :  { %p710_p10 = por %p709_p9, %p708_p8 }
  0x52   :  { %p711_p11 = pnand %p710_p10, %p704_p7 }
  0x54   :  { %714 = shalt.err (!%p711_p11)
}
  0x55   :  { %82 = dma.hbm_to_vmem [thread:$0]  %s1036_s6, 512, %s77_s20, [#allocation9], %s818_s18, %s818_s18, %s819_s22  }
  0x56   :  { %803 = dma.done.wait [#allocation3], 128  }
  0x57   :  { %804 = vsyncadd [#allocation3], 4294967168 }
  0x58   :  { %805 = dma.done.wait [#allocation6], 640  }
  0x59   :  { %806 = vsyncadd [#allocation6], 4294966656 }
  0x5a   :  { %807 = dma.done.wait [#allocation9], 1024  }
  0x5b   :  { %808 = vsyncadd [#allocation9], 4294966272  ;;  %v822_v0 = vmov 0.0|0.0   ;;  %vm823_vm0 = vmmov 0   ;;  %v824_v1 = vmov 0.0   ;;  %v101_v2 = vld [vmem:[#allocation7] sm:$0xff] }
  0x5c   :  { %556 = vmatprep.subr.bf16.mxu0 %v822_v0  ;;  %531 = vmatprep.mubr.msk.f32.mxu0 %vm823_vm0, %v824_v1  ;;  %v102_v3 = vld [vmem:[#allocation7 + $0x8] sm:$0xff]  ;;  %v103_v4 = vld [vmem:[#allocation7 + $0x10] sm:$0xff]  ;;  %v104_v6 = vld [vmem:[#allocation7 + $0x18] sm:$0xff]  ;;  %vm112_vm1 = vcmask 261120   ;;  %vm409_vm4 = vcmask 130048   ;;  %s826_s21 = smov [#allocation12]  }
  0x5d   :  { %562 = vmatprep.subr.bf16.mxu1 %v822_v0  ;;  %542 = vmatprep.mubr.msk.f32.mxu1 %vm823_vm0, %v824_v1  ;;  %v557_v5 = vpack.c.bf16 %v102_v3, %v101_v2  ;;  %v560_v7 = vpack.c.bf16 %v104_v6, %v103_v4  ;;  %v100_v8 = vld [vmem:[#allocation2] sm:$0xff]  ;;  %v201_v9 = vld [vmem:[#allocation8] sm:$0xff]  ;;  %v202_v10 = vld [vmem:[#allocation8 + $0x8] sm:$0xff]  ;;  %s460_s1 = sshll.u32 %s826_s21, 4  ;;  %s827_s23 = smov [#allocation11]   ;;  %s461_s1 = int_to_ptr.vmem [resolvable:$true] %s460_s1 }
  0x5e   :  { %v563_v11 = vpack.c.bf16 %v202_v10, %v201_v9  ;;  %v203_v12 = vld [vmem:[#allocation8 + $0x10] sm:$0xff]  ;;  %v204_v13 = vld [vmem:[#allocation8 + $0x18] sm:$0xff]  ;;  %v300_v33 = vld [vmem:[#allocation10] sm:$0xff]  ;;  %s450_s24 = sshll.u32 %s827_s23, 4  ;;  %s715_s25 = scalar_lea.vmem %s461_s1, 128  ;;  %s451_s24 = int_to_ptr.vmem [resolvable:$true] %s450_s24 }
  0x5f   :  { %558 = vmatpush3.bf16.msra.mxu0 %v557_v5  ;;  %v566_v14 = vpack.c.bf16 %v204_v13, %v203_v12  ;;  %v502_v15 = vld [vmem:[%s1033_s3] ss:$0 sm:$0xff]  ;;  %v301_v34 = vld [vmem:[#allocation10 + $0x8] sm:$0xff]  ;;  %v303_v37 = vld [vmem:[#allocation10 + $0x18] sm:$0xff]  ;;  %p716_p12 = scmp.ne.s32.totalorder %s461_s1, %s715_s25  ;;  %p720_p13 = scmp.lt.s32.totalorder %s461_s1, %s461_s1 }
  0x60   :  { %559 = vmatprep.subr.bf16.mxu0 %v822_v0  ;;  %564 = vmatpush3.bf16.msra.mxu1 %v563_v11  ;;  %v569_v35 = vpack.c.bf16 %v301_v34, %v300_v33  ;;  %v302_v36 = vld [vmem:[#allocation10 + $0x10] sm:$0xff]  ;;  %p721_p0 = scmp.lt.s32.totalorder %s715_s25, %s715_s25 }
  0x61   :  { %565 = vmatprep.subr.bf16.mxu1 %v822_v0  ;;  %v572_v38 = vpack.c.bf16 %v303_v37, %v302_v36  ;;  %v504_v39 = vld [vmem:[%s1035_s5] ss:$0 sm:$0xff] }
  0x62   :  { %v506_v57 = vld [vmem:[%s1037_s7] ss:$0 sm:$0xff]  ;;  %s825_s7 = smov 112   ;;  %p722_p1 = por %p721_p0, %p720_p13 }
  0x63   :  { %561 = vmatpush3.bf16.msra.mxu0 %v560_v7 }
  0x64   :  { %568 = vmatprep.subr.bf16.mxu0 %v822_v0  ;;  %567 = vmatpush3.bf16.msra.mxu1 %v566_v14  ;;  %p723_p2 = pnand %p722_p1, %p716_p12 }
  0x66   :  { %532 = vmatmul.mubr.msk.f32.vlgmr.msra.gmra.mrb[0].mxu0 %vm112_vm1, %v100_v8 }
  0x67   :  { %553 = vmatprep.mubr.msk.f32.mxu0 %vm823_vm0, %v824_v1  ;;  %570 = vmatpush3.bf16.msra.mxu0 %v569_v35 }
  0x68   :  { %571 = vmatprep.subr.bf16.mxu0 %v822_v0 }
  0x6b   :  { %573 = vmatpush3.bf16.msra.mxu0 %v572_v38 }
 0x139   :  { %v182_v16 = vpop.f32.mrb[0].mxu0 }
 0x13a   :  { %v183_v17 = vadd.f32 %v502_v15, %v182_v16  ;;  %v533_v18 = vpop.f32.mrb[1].mxu0 }
 0x13c   :  { %v187_v19 = vand.u32 2147483647, %v183_v17  ;;  %v186_v30 = vmax.f32 %v183_v17, 0.0 }
 0x13e   :  { %v188_v20 = vsub.f32 0.0, %v187_v19 }
 0x140   :  { %v189_v21 = vmul.f32 1.442695, %v188_v20 }
 0x142   :  { %589 = vpow2.f32 %v189_v21 }
 0x14c   :  { %v590_v22 = vpop.eup %589 }
 0x14d   :  { %v191_v23 = vadd.f32 1.0, %v590_v22  ;;  %v194_v24 = vmul.f32 -0.5, %v590_v22  ;;  %v197_v26 = vand.u32 2147483647, %v590_v22 }
 0x14f   :  { %591 = vlog2.f32 %v191_v23  ;;  %v195_v25 = vadd.f32 1.0, %v194_v24  ;;  %vm198_vm2 = vcmp.lt.f32.partialorder %v197_v26, 0.0004427343 }
 0x151   :  { %v196_v29 = vmul.f32 %v590_v22, %v195_v25  ;;  %v422_v22 = vld [vmem:[#allocation5] sm:$0xff] }
 0x159   :  { %v592_v27 = vpop.eup %591 }
 0x15a   :  { %v193_v28 = vmul.f32 0.6931472, %v592_v27 }
 0x15c   :  { %v199_v31 = vsel %vm198_vm2, %v196_v29, %v193_v28 }
 0x15d   :  { %v200_v32 = vadd.f32 %v199_v31, %v186_v30 }
 0x15f   :  { %543 = vmatmul.mubr.msk.f32.vlgmr.msra.gmra.mrb[0].mxu1 %vm112_vm1, %v200_v32 }
 0x232   :  { %v281_v40 = vpop.f32.mrb[0].mxu1 }
 0x233   :  { %v282_v41 = vadd.f32 %v504_v39, %v281_v40  ;;  %v544_v42 = vpop.f32.mrb[1].mxu1 }
 0x235   :  { %v286_v43 = vand.u32 2147483647, %v282_v41  ;;  %v285_v54 = vmax.f32 %v282_v41, 0.0 }
 0x237   :  { %v287_v44 = vsub.f32 0.0, %v286_v43 }
 0x239   :  { %v288_v45 = vmul.f32 1.442695, %v287_v44 }
 0x23b   :  { %593 = vpow2.f32 %v288_v45 }
 0x245   :  { %v594_v46 = vpop.eup %593 }
 0x246   :  { %v290_v47 = vadd.f32 1.0, %v594_v46  ;;  %v293_v48 = vmul.f32 -0.5, %v594_v46  ;;  %v296_v50 = vand.u32 2147483647, %v594_v46 }
 0x248   :  { %595 = vlog2.f32 %v290_v47  ;;  %v294_v49 = vadd.f32 1.0, %v293_v48  ;;  %vm297_vm3 = vcmp.lt.f32.partialorder %v296_v50, 0.0004427343 }
 0x24a   :  { %v295_v53 = vmul.f32 %v594_v46, %v294_v49 }
 0x252   :  { %v596_v51 = vpop.eup %595 }
 0x253   :  { %v292_v52 = vmul.f32 0.6931472, %v596_v51 }
 0x255   :  { %v298_v55 = vsel %vm297_vm3, %v295_v53, %v292_v52 }
 0x256   :  { %v299_v56 = vadd.f32 %v298_v55, %v285_v54 }
 0x258   :  { %554 = vmatmul.mubr.msk.f32.vlgmr.msra.gmra.mrb[2].mxu0 %vm112_vm1, %v299_v56 }
 0x32b   :  { %v380_v58 = vpop.f32.mrb[2].mxu0 }
 0x32c   :  { %v381_v59 = vadd.f32 %v506_v57, %v380_v58  ;;  %v555_v60 = vpop.f32.mrb[3].mxu0 }
 0x32e   :  { %v384_v61 = vsel %vm112_vm1, %v381_v59, 0.0 }
 0x32f   :  { %v385_v62 = vrot.slane %v384_v61, 4 }
 0x331   :  { %v386_v63 = vadd.f32 %v385_v62, %v384_v61 }
 0x333   :  { %v387_v0 = vrot.slane %v386_v63, 2 }
 0x335   :  { %v388_v1 = vadd.f32 %v387_v0, %v386_v63 }
 0x337   :  { %v389_v2 = vrot.slane %v388_v1, 1 }
 0x339   :  { %v390_v3 = vadd.f32 %v389_v2, %v388_v1 }
 0x33b   :  { %v392_v4 = vmul.f32 0.125, %v390_v3 }
 0x33d   :  { %v393_v5 = vsub.f32 %v381_v59, %v392_v4 }
 0x33f   :  { %v394_v6 = vmul.f32 %v393_v5, %v393_v5 }
 0x341   :  { %v395_v7 = vsel %vm112_vm1, %v394_v6, 0.0 }
 0x342   :  { %v396_v8 = vrot.slane %v395_v7, 4 }
 0x344   :  { %v397_v9 = vadd.f32 %v396_v8, %v395_v7 }
 0x346   :  { %v398_v10 = vrot.slane %v397_v9, 2 }
 0x348   :  { %v399_v11 = vadd.f32 %v398_v10, %v397_v9 }
 0x34a   :  { %v400_v12 = vrot.slane %v399_v11, 1 }
 0x34c   :  { %v401_v13 = vadd.f32 %v400_v12, %v399_v11 }
 0x34e   :  { %v402_v14 = vmul.f32 0.125, %v401_v13 }
 0x350   :  { %v403_v15 = vadd.f32 1e-05, %v402_v14 }
 0x352   :  { %597 = vrsqrt.f32 %v403_v15 }
 0x35c   :  { %v598_v16 = vpop.eup %597 }
 0x35d   :  { %v405_v17 = vmul.f32 %v598_v16, %v393_v5 }
 0x35f   :  { %v406_v18 = vmul.f32 0.5, %v405_v17  ;;  %410 = vst.msk [vmem:[#allocation11] sm:$0xff] %vm409_vm4, %v405_v17 }
 0x361   :  { %v407_v19 = vmul.f32 1.442695, %v406_v18 }
 0x363   :  { %599 = vpow2.f32 %v407_v19 }
 0x36d   :  { %v600_v20 = vpop.eup %599 }
 0x36e   :  { %424 = vrot.lane.b32.xlu0 %v600_v20, %s825_s7  ;;  %v411_v21 = vmul.f32 %v600_v20, %v600_v20 }
 0x370   :  { %413 = vrot.lane.b32.xlu1 %v411_v21, %s825_s7 }
 0x3e0   :  { %v425_v23 = vpop.permute.xlu0 %424 }
 0x3e1   :  { %v427_v24 = vmul.f32 %v425_v23, %v422_v22 }
 0x3e2   :  { %v414_v25 = vpop.permute.xlu1 %413 }
 0x3e3   :  { %v428_v26 = vadd.f32 %v427_v24, %v405_v17  ;;  %416 = vst.msk [vmem:[#allocation12] sm:$0xff] %vm409_vm4, %v414_v25 }
 0x3e5   :  { %v429_v27 = vsel %vm409_vm4, %v428_v26, -inf }
 0x3e6   :  { %430 = vmax.xlane.f32.xlu0 %v429_v27 }
 0x473   :  { %v431_v28 = vpop.xlane.xlu0 %430 }
 0x474   :  { %v432_v29 = vsub.f32 %v428_v26, %v431_v28 }
 0x476   :  { %v433_v30 = vmul.f32 1.442695, %v432_v29 }
 0x478   :  { %601 = vpow2.f32 %v433_v30 }
 0x482   :  { %v602_v31 = vpop.eup %601 }
 0x483   :  { %v435_v32 = vsel %vm409_vm4, %v602_v31, 0.0 }
 0x484   :  { %436 = vadd.xlane.f32.xlu1 %v435_v32 }
 0x495   :  { %418 = vrot.lane.b32.xlu1 %v405_v17, %s825_s7 }
 0x496   :  { %726 = shalt.err (!%p723_p2)
}
 0x497   :  { %s727_s0 = scalar_lea.hbm %s1039_s9, 128 }
 0x498   :  { %p728_p3 = scmp.ne.s32.totalorder %s1039_s9, %s727_s0  ;;  %p731_p4 = scmp.lt.u32.totalorder %s727_s0, %s1039_s9 }
 0x49a   :  { %p733_p5 = pnand %p731_p4, %p728_p3 }
 0x49c   :  { %736 = shalt.err (!%p733_p5)
}
 0x49d   :  { %463 = dma.vmem_to_hbm [thread:$0]  %s461_s1, 128, %s1039_s9, [#allocation13]  }
 0x49e   :  { %s737_s4 = scalar_lea.vmem %s451_s24, 128  ;;  %p742_p7 = scmp.lt.s32.totalorder %s451_s24, %s451_s24 }
 0x49f   :  { %p738_p6 = scmp.ne.s32.totalorder %s451_s24, %s737_s4  ;;  %p743_p8 = scmp.lt.s32.totalorder %s737_s4, %s737_s4 }
 0x4a1   :  { %p744_p9 = por %p743_p8, %p742_p7 }
 0x4a3   :  { %p745_p10 = pnand %p744_p9, %p738_p6 }
 0x4a5   :  { %748 = shalt.err (!%p745_p10)
}
 0x4a6   :  { %s749_s19 = scalar_lea.hbm %s1038_s8, 128 }
 0x4a7   :  { %p750_p11 = scmp.ne.s32.totalorder %s1038_s8, %s749_s19  ;;  %p753_p12 = scmp.lt.u32.totalorder %s749_s19, %s1038_s8 }
 0x4a9   :  { %p755_p13 = pnand %p753_p12, %p750_p11 }
 0x4ab   :  { %758 = shalt.err (!%p755_p13)
}
 0x4ac   :  { %453 = dma.vmem_to_hbm [thread:$0]  %s451_s24, 128, %s1038_s8, [#allocation4]  }
 0x4ad   :  { %s828_s22 = smov [#allocation14]  }
 0x4ae   :  { %s470_s5 = sshll.u32 %s828_s22, 4  ;;  %s471_s5 = int_to_ptr.vmem [resolvable:$true] %s470_s5 }
 0x4af   :  { %s759_s20 = scalar_lea.vmem %s471_s5, 128  ;;  %p764_p1 = scmp.lt.s32.totalorder %s471_s5, %s471_s5 }
 0x4b0   :  { %p760_p0 = scmp.ne.s32.totalorder %s471_s5, %s759_s20  ;;  %p765_p2 = scmp.lt.s32.totalorder %s759_s20, %s759_s20 }
 0x4b2   :  { %p766_p3 = por %p765_p2, %p764_p1 }
 0x4b4   :  { %p767_p4 = pnand %p766_p3, %p760_p0 }
 0x511   :  { %v437_v33 = vpop.xlane.xlu1 %436 }
 0x512   :  { %603 = vrcp.f32 %v437_v33 }
 0x515   :  { %v419_v34 = vpop.permute.xlu1 %418 }
 0x516   :  { %421 = vst.msk [vmem:[#allocation14] sm:$0xff] %vm409_vm4, %v419_v34 }
 0x517   :  { %770 = shalt.err (!%p767_p4)
}
 0x518   :  { %s771_s1 = scalar_lea.hbm %s1040_s10, 128 }
 0x519   :  { %p772_p5 = scmp.ne.s32.totalorder %s1040_s10, %s771_s1  ;;  %p775_p6 = scmp.lt.u32.totalorder %s771_s1, %s1040_s10 }
 0x51b   :  { %p777_p7 = pnand %p775_p6, %p772_p5 }
 0x51d   :  { %780 = shalt.err (!%p777_p7)
}
 0x51e   :  { %473 = dma.vmem_to_hbm [thread:$0]  %s471_s5, 128, %s1040_s10, [#allocation13]   ;;  %v604_v35 = vpop.eup %603 }
 0x51f   :  { %v439_v36 = vmul.f32 %v604_v35, %v437_v33  ;;  %s829_s0 = smov [#allocation15]  }
 0x520   :  { %s480_s13 = sshll.u32 %s829_s0, 4  ;;  %s481_s13 = int_to_ptr.vmem [resolvable:$true] %s480_s13 }
 0x521   :  { %v440_v37 = vsub.f32 2.0, %v439_v36  ;;  %s781_s28 = scalar_lea.vmem %s481_s13, 128  ;;  %p786_p9 = scmp.lt.s32.totalorder %s481_s13, %s481_s13 }
 0x522   :  { %p782_p8 = scmp.ne.s32.totalorder %s481_s13, %s781_s28  ;;  %p787_p10 = scmp.lt.s32.totalorder %s781_s28, %s781_s28 }
 0x523   :  { %v441_v38 = vmul.f32 %v604_v35, %v440_v37 }
 0x524   :  { %p788_p11 = por %p787_p10, %p786_p9 }
 0x525   :  { %v442_v39 = vmul.f32 %v602_v31, %v441_v38 }
 0x526   :  { %p789_p12 = pnand %p788_p11, %p782_p8 }
 0x527   :  { %443 = vst.msk [vmem:[#allocation15] sm:$0xff] %vm409_vm4, %v442_v39 }
 0x528   :  { %792 = shalt.err (!%p789_p12)
}
 0x529   :  { %s793_s10 = scalar_lea.hbm %s1041_s11, 128 }
 0x52a   :  { %p794_p13 = scmp.ne.s32.totalorder %s1041_s11, %s793_s10  ;;  %p797_p0 = scmp.lt.u32.totalorder %s793_s10, %s1041_s11 }
 0x52c   :  { %p799_p1 = pnand %p797_p0, %p794_p13 }
 0x52e   :  { %802 = shalt.err (!%p799_p1)
}
 0x52f   :  { %483 = dma.vmem_to_hbm [thread:$0]  %s481_s13, 128, %s1041_s11, [#allocation16]  }
 0x530   :  { %809 = dma.done.wait [#allocation4], 128  }
 0x531   :  { %810 = vsyncadd [#allocation4], 4294967168 }
 0x532   :  { %811 = dma.done.wait [#allocation13], 256  }
 0x533   :  { %812 = vsyncadd [#allocation13], 4294967040 }
 0x534   :  { %813 = dma.done.wait [#allocation16], 128  }
 0x535   :  { %814 = vsyncadd [#allocation16], 4294967168 }
 0x536   :  { %496 = vsyncpa [#allocation3], 1 }
 0x537   :  { %497 = vsyncpa [#allocation6], 1 }
 0x538   :  { %498 = vsyncpa [#allocation9], 1 }
 0x539   :  { %499 = vsyncpa [#allocation4], 1 }
 0x53a   :  { %500 = vsyncpa [#allocation13], 1 }
 0x53b   :  { %501 = vsyncpa [#allocation16], 1 }

</bundles_post_ra>
